<compile_context>
chip_gen: v6e
topology: v6e:2x2x1
jax: 0.10.0
libtpu: 0.0.40
codegen_flags: <defaults>
</compile_context>

<pallas_src>
import functools

import jax
import jax.numpy as jnp
from jax.experimental import pallas as pl
from jax.experimental.pallas import tpu as pltpu


# ----------------------------------------------------------------------------
# Pallas kernel: P graph pairs per grid step (super block-diagonal GCN stack).
# ----------------------------------------------------------------------------
def gmn_fused_kernel(a_ref, h0_ref, pa_ref, w2_ref, v_ref, o_ref, *, p):
    f32 = jnp.float32
    bf16 = jnp.bfloat16

    b1 = v_ref[0:1, :]           # (1, H) f32
    b2 = v_ref[1:2, :]           # (1, H) f32
    wfc = v_ref[2:3, :]          # (1, H) f32  (fc weight as a row)
    bfc = v_ref[3:4, 0:1]        # (1, 1) f32  (fc bias)

    # conv1: A_hat @ (X W1) + b1, ReLU.  (X W1 precomputed in wrapper; bf16
    # MXU operands, f32 accumulate; zero off-diagonal blocks decouple pairs.)
    h = jnp.dot(a_ref[...], h0_ref[...], preferred_element_type=f32) + b1
    h = jnp.maximum(h, 0.0)                                   # (N, H) f32

    # conv2 + mean pool, folded:  g = (Pool @ A_hat) @ (H W2) + b2.
    z = jnp.dot(h.astype(bf16), w2_ref[...], preferred_element_type=f32)   # (N, H)
    g = jnp.dot(pa_ref[...], z.astype(bf16), preferred_element_type=f32) + b2  # (2P, H)

    # Pair scores: |g1 - g2| . wfc + bfc   (VPU mul + lane reduce, no MXU).
    d = jnp.abs(g[:p, :] - g[p:, :])                          # (P, H)
    scores = jnp.sum(d * wfc, axis=1, keepdims=True) + bfc    # (P, 1)

    # Lane-dense store: fill the whole (P, 128) block (score replicated along
    # lanes); wrapper slices lane 0.
    o_ref[...] = jnp.broadcast_to(scores, o_ref.shape)


def gmn_forward(a_super, h0, pa, w2_bf, v_slab, *, pairs_per_step):
    """a_super:(S,N,N) bf16, h0:(S,N,H) bf16, pa:(S,2P,N) bf16, w2:(H,H) bf16,
    v_slab:(8,H) f32.  Returns (S*P,) f32 similarity scores."""
    steps, nfused, _ = a_super.shape
    hidden = w2_bf.shape[-1]
    p = pairs_per_step
    kernel = functools.partial(gmn_fused_kernel, p=p)
    out = pl.pallas_call(
        kernel,
        grid=(steps,),
        in_specs=[
            pl.BlockSpec((None, nfused, nfused), lambda s: (s, 0, 0)),  # fused A_hat
            pl.BlockSpec((None, nfused, hidden), lambda s: (s, 0, 0)),  # X @ W1
            pl.BlockSpec((None, 2 * p, nfused), lambda s: (s, 0, 0)),   # Pool @ A_hat
            pl.BlockSpec((hidden, hidden), lambda s: (0, 0)),           # W2 (resident)
            pl.BlockSpec(v_slab.shape, lambda s: (0, 0)),               # bias/fc slab
        ],
        out_specs=pl.BlockSpec((None, p, hidden), lambda s: (s, 0, 0)),
        out_shape=jax.ShapeDtypeStruct((steps, p, hidden), jnp.float32),
        compiler_params=pltpu.CompilerParams(
            dimension_semantics=("parallel",)),
    )(a_super, h0, pa, w2_bf, v_slab)
    return out[:, :, 0].reshape(steps * p)


# ----------------------------------------------------------------------------
# Wrapper glue: scatter-free GCN normalization, block-diag fusion, pooling
# matrix, parameter packing (all plain XLA, done once).
# ----------------------------------------------------------------------------
def normalized_adjacency(edge_index, num_nodes):
    src, dst = edge_index[0], edge_index[1]
    # Scatter-free: one-hot endpoints and contract (sums duplicate edges).
    src_oh = jax.nn.one_hot(src, num_nodes, dtype=jnp.float32)   # (E, N)
    dst_oh = jax.nn.one_hot(dst, num_nodes, dtype=jnp.float32)   # (E, N)
    adj = dst_oh.T @ src_oh                                      # adj[i, j]: j -> i
    adj = adj + jnp.eye(num_nodes, dtype=jnp.float32)            # self loops
    deg = jnp.sum(adj, axis=1)
    dinv = jnp.where(deg > 0, jax.lax.rsqrt(deg), 0.0)
    return adj * dinv[:, None] * dinv[None, :]


def block_diag2(a_top, a_bot):
    n1, n2 = a_top.shape[0], a_bot.shape[0]
    z12 = jnp.zeros((n1, n2), a_top.dtype)
    z21 = jnp.zeros((n2, n1), a_top.dtype)
    return jnp.concatenate(
        [jnp.concatenate([a_top, z12], axis=1),
         jnp.concatenate([z21, a_bot], axis=1)], axis=0)


def block_diag_stack(blocks):
    """(P, n, n) per-pair blocks -> (P*n, P*n) super block-diagonal."""
    p, n, _ = blocks.shape
    eye = jnp.eye(p, dtype=blocks.dtype)
    big = jnp.einsum('pq,pab->paqb', eye, blocks)   # (P, n, P, n)
    return big.reshape(p * n, p * n)


def pool_matrix(num_pairs, nt, n1, dtype=jnp.float32):
    """(2P, P*NT) mean-pool matrix: rows 0..P-1 pool graph 1 of each pair,
    rows P..2P-1 pool graph 2.  Rows sum to 1 (scaled 1/n)."""
    n2 = nt - n1
    cols = jnp.arange(num_pairs * nt)
    pair = cols // nt
    pos = cols % nt
    in_g1 = pos < n1
    row = jnp.where(in_g1, pair, num_pairs + pair)
    val = jnp.where(in_g1, 1.0 / n1, 1.0 / n2).astype(dtype)
    onehot = jax.nn.one_hot(row, 2 * num_pairs, dtype=dtype)     # (P*NT, 2P)
    return onehot.T * val[None, :]                               # (2P, P*NT)


def pack_vector_slab(b1, b2, wfc_row, bfc):
    """f32 slab: row0=b1, row1=b2, row2=fc weight row, row3[0]=fc bias."""
    h = b1.shape[0]
    slab = jnp.zeros((8, h), jnp.float32)
    slab = slab.at[0, :].set(b1)
    slab = slab.at[1, :].set(b2)
    slab = slab.at[2, :].set(wfc_row)
    slab = slab.at[3, 0].set(bfc)
    return slab


# ----------------------------------------------------------------------------
# Pure-JAX references (for sanity checks).
# ----------------------------------------------------------------------------
def gmn_reference_folded(a_pair, pa_pair, xw1_pairs, w2, b1, b2, wfc, bfc, *,
                         bf16_matmul):
    """Per-pair reference of the exact kernel math (folded pool, same casts)."""
    f32 = jnp.float32
    cast = (lambda v: v.astype(jnp.bfloat16)) if bf16_matmul else (lambda v: v)

    def one(xw1):
        h = jnp.dot(cast(a_pair), cast(xw1), preferred_element_type=f32) + b1
        h = jnp.maximum(h, 0.0)
        z = jnp.dot(cast(h), cast(w2), preferred_element_type=f32)
        g = jnp.dot(cast(pa_pair), cast(z), preferred_element_type=f32) + b2
        return jnp.sum(jnp.abs(g[0] - g[1]) * wfc) + bfc

    return jax.vmap(one)(xw1_pairs)


def gmn_reference_module(a_pair, x_pairs, w1, w2, b1, b2, wfc, bfc, *, n1):
    """Original module semantics, pure f32 (block-diag == two separate graphs)."""
    def one(x):
        h = jnp.maximum(a_pair @ (x @ w1) + b1, 0.0)
        z = a_pair @ (h @ w2) + b2
        g1 = jnp.mean(z[:n1], axis=0)
        g2 = jnp.mean(z[n1:], axis=0)
        return jnp.sum(jnp.abs(g1 - g2) * wfc) + bfc

    return jax.vmap(one)(x_pairs)


# ----------------------------------------------------------------------------
if __name__ == "__main__":
    IN_CHANNELS = 4
    HIDDEN = 128            # lane-dense hidden width
    N1 = 8
    N2 = 8
    NT = N1 + N2
    PAIRS_PER_STEP = 8      # P*NT = 128 fused nodes/step (use 16 on v6e/v7x)
    B = 16                  # total graph pairs; >=2 grid steps keeps v7x busy
    assert B % PAIRS_PER_STEP == 0
    assert NT == N1 + N2    # no node padding -> static mean divisors are exact
    STEPS = B // PAIRS_PER_STEP
    NFUSED = PAIRS_PER_STEP * NT

    key = jax.random.PRNGKey(0)
    k_x1, k_x2, k_w1, k_b1, k_w2, k_b2, k_wfc, k_bfc = jax.random.split(key, 8)

    # --- graph structures (ring; ring + chord), edges in both directions -----
    def ring_edges(n):
        s = jnp.arange(n, dtype=jnp.int32)
        d = (s + 1) % n
        return jnp.stack([jnp.concatenate([s, d]), jnp.concatenate([d, s])], 0)

    e1 = ring_edges(N1)
    e2 = jnp.concatenate([ring_edges(N2),
                          jnp.array([[0, 4], [4, 0]], jnp.int32)], axis=1)
    a1 = normalized_adjacency(e1, N1)
    a2 = normalized_adjacency(e2, N2)
    a_pair = block_diag2(a1, a2)                                  # (NT, NT) f32

    # --- node features and parameters ----------------------------------------
    x1 = jax.random.normal(k_x1, (B, N1, IN_CHANNELS), jnp.float32)
    x2 = jax.random.normal(k_x2, (B, N2, IN_CHANNELS), jnp.float32)
    x_cat = jnp.concatenate([x1, x2], axis=1)                     # (B, NT, C)

    w1 = jax.random.normal(k_w1, (IN_CHANNELS, HIDDEN), jnp.float32) / jnp.sqrt(IN_CHANNELS)
    b1 = 0.1 * jax.random.normal(k_b1, (HIDDEN,), jnp.float32)
    w2 = jax.random.normal(k_w2, (HIDDEN, HIDDEN), jnp.float32) / jnp.sqrt(HIDDEN)
    b2 = 0.1 * jax.random.normal(k_b2, (HIDDEN,), jnp.float32)
    wfc = jax.random.normal(k_wfc, (HIDDEN,), jnp.float32) / jnp.sqrt(HIDDEN)
    bfc = jax.random.normal(k_bfc, (), jnp.float32) * 0.1

    # --- wrapper-side fusion / packing (XLA glue, done once) -----------------
    # Super block-diagonal adjacency over P pairs (same structure for every
    # pair in this example, so one fused block is reused across steps).
    a_stack = jnp.broadcast_to(a_pair, (PAIRS_PER_STEP, NT, NT))
    a_fused = block_diag_stack(a_stack)                           # (NFUSED, NFUSED)
    a_super = jnp.broadcast_to(a_fused, (STEPS, NFUSED, NFUSED)).astype(jnp.bfloat16)

    # Pooling fold: PA = Pool @ A_hat (2 pooled rows per pair).
    pool = pool_matrix(PAIRS_PER_STEP, NT, N1)                    # (2P, NFUSED)
    pa_fused = pool @ a_fused                                     # (2P, NFUSED) f32
    pa = jnp.broadcast_to(pa_fused,
                          (STEPS, 2 * PAIRS_PER_STEP, NFUSED)).astype(jnp.bfloat16)

    # Hoist the degenerate K=4 matmul: H0 = X @ W1 (lane-dense, last dim 128).
    xw1 = jnp.einsum('bnc,ch->bnh', x_cat, w1)                    # (B, NT, H) f32
    h0 = xw1.reshape(STEPS, NFUSED, HIDDEN).astype(jnp.bfloat16)

    w2_bf = w2.astype(jnp.bfloat16)
    v_slab = pack_vector_slab(b1, b2, wfc, bfc)                   # (8, H) f32

    # --- run kernel -----------------------------------------------------------
    sim = gmn_forward(a_super, h0, pa, w2_bf, v_slab,
                      pairs_per_step=PAIRS_PER_STEP)
    sim = jax.block_until_ready(sim)

    # Tight check: per-pair reference with identical bf16 casts / folded pool.
    pool1 = pool_matrix(1, NT, N1)                                # (2, NT)
    pa_pair = pool1 @ a_pair                                      # (2, NT)
    ref16 = gmn_reference_folded(a_pair, pa_pair, xw1, w2, b1, b2, wfc, bfc,
                                 bf16_matmul=True)
    assert jnp.allclose(sim, ref16, atol=2e-3, rtol=2e-3), (sim, ref16)

    # Loose check: original module semantics in pure f32 (gap = bf16 rounding).
    ref32 = gmn_reference_module(a_pair, x_cat, w1, w2, b1, b2, wfc, bfc, n1=N1)
    assert jnp.allclose(sim, ref32, atol=1e-1, rtol=1e-1), (sim, ref32)

    print("KERNEL_OK")
</pallas_src>

<mosaic_0001>
module attributes {stable_mosaic.version = 11 : i64} {
  func.func @gmn_fused_kernel(%arg0: i32, %arg1: memref<1x128x128xbf16, #tpu.memory_space<vmem>>, %arg2: memref<1x128x128xbf16, #tpu.memory_space<vmem>>, %arg3: memref<1x16x128xbf16, #tpu.memory_space<vmem>>, %arg4: memref<128x128xbf16, #tpu.memory_space<vmem>>, %arg5: memref<8x128xf32, #tpu.memory_space<vmem>>, %arg6: memref<1x8x128xf32, #tpu.memory_space<vmem>>) attributes {dimension_semantics = [#tpu.dimension_semantics<parallel>], iteration_bounds = array<i64: 2>, scalar_prefetch = 0 : i64, scratch_operands = 0 : i64, tpu.core_type = #tpu.core_type<tc>, window_params = [{transform_indices = @transform_0, window_bounds = array<i64: 1, 128, 128>}, {transform_indices = @transform_1, window_bounds = array<i64: 1, 128, 128>}, {transform_indices = @transform_2, window_bounds = array<i64: 1, 16, 128>}, {pipeline_mode = #tpu.pipeline_mode<synchronous>, transform_indices = @transform_3, window_bounds = array<i64: 128, 128>}, {pipeline_mode = #tpu.pipeline_mode<synchronous>, transform_indices = @transform_4, window_bounds = array<i64: 8, 128>}, {transform_indices = @transform_5, window_bounds = array<i64: 1, 8, 128>}]} {
    %c0 = arith.constant 0 : index
    %c0_0 = arith.constant 0 : index
    %0 = vector.load %arg5[%c0, %c0_0] : memref<8x128xf32, #tpu.memory_space<vmem>>, vector<1x128xf32>
    %c1 = arith.constant 1 : index
    %c0_1 = arith.constant 0 : index
    %1 = vector.load %arg5[%c1, %c0_1] : memref<8x128xf32, #tpu.memory_space<vmem>>, vector<1x128xf32>
    %c2 = arith.constant 2 : index
    %c0_2 = arith.constant 0 : index
    %2 = vector.load %arg5[%c2, %c0_2] : memref<8x128xf32, #tpu.memory_space<vmem>>, vector<1x128xf32>
    %c3 = arith.constant 3 : index
    %c0_3 = arith.constant 0 : index
    %3 = vector.load %arg5[%c3, %c0_3] : memref<8x128xf32, #tpu.memory_space<vmem>>, vector<1x1xf32>
    %c0_4 = arith.constant 0 : index
    %c0_5 = arith.constant 0 : index
    %c0_6 = arith.constant 0 : index
    %4 = vector.load %arg1[%c0_4, %c0_5, %c0_6] : memref<1x128x128xbf16, #tpu.memory_space<vmem>>, vector<1x128x128xbf16>
    %5 = vector.shape_cast %4 : vector<1x128x128xbf16> to vector<128x128xbf16>
    %c0_7 = arith.constant 0 : index
    %c0_8 = arith.constant 0 : index
    %c0_9 = arith.constant 0 : index
    %6 = vector.load %arg2[%c0_7, %c0_8, %c0_9] : memref<1x128x128xbf16, #tpu.memory_space<vmem>>, vector<1x128x128xbf16>
    %7 = vector.shape_cast %6 : vector<1x128x128xbf16> to vector<128x128xbf16>
    %cst = arith.constant dense<0.000000e+00> : vector<128x128xf32>
    %8 = tpu.matmul %5, %7, %cst {dimension_numbers = #tpu.dot_dimension_numbers<[1], [0], [0], [1], [0, 0, 1, 1], [], []>} : vector<128x128xbf16>, vector<128x128xbf16>, vector<128x128xf32> -> vector<128x128xf32>
    %9 = vector.broadcast %0 : vector<1x128xf32> to vector<128x128xf32>
    %10 = arith.addf %8, %9 : vector<128x128xf32>
    %cst_10 = arith.constant 0.000000e+00 : f32
    %11 = vector.broadcast %cst_10 : f32 to vector<128x128xf32>
    %12 = arith.maximumf %10, %11 : vector<128x128xf32>
    %13 = arith.truncf %12 : vector<128x128xf32> to vector<128x128xbf16>
    %c0_11 = arith.constant 0 : index
    %c0_12 = arith.constant 0 : index
    %14 = vector.load %arg4[%c0_11, %c0_12] : memref<128x128xbf16, #tpu.memory_space<vmem>>, vector<128x128xbf16>
    %cst_13 = arith.constant dense<0.000000e+00> : vector<128x128xf32>
    %15 = tpu.matmul %13, %14, %cst_13 {dimension_numbers = #tpu.dot_dimension_numbers<[1], [0], [0], [1], [0, 0, 1, 1], [], []>} : vector<128x128xbf16>, vector<128x128xbf16>, vector<128x128xf32> -> vector<128x128xf32>
    %c0_14 = arith.constant 0 : index
    %c0_15 = arith.constant 0 : index
    %c0_16 = arith.constant 0 : index
    %16 = vector.load %arg3[%c0_14, %c0_15, %c0_16] : memref<1x16x128xbf16, #tpu.memory_space<vmem>>, vector<1x16x128xbf16>
    %17 = vector.shape_cast %16 : vector<1x16x128xbf16> to vector<16x128xbf16>
    %18 = arith.truncf %15 : vector<128x128xf32> to vector<128x128xbf16>
    %cst_17 = arith.constant dense<0.000000e+00> : vector<16x128xf32>
    %19 = tpu.matmul %17, %18, %cst_17 {dimension_numbers = #tpu.dot_dimension_numbers<[1], [0], [0], [1], [0, 0, 1, 1], [], []>} : vector<16x128xbf16>, vector<128x128xbf16>, vector<16x128xf32> -> vector<16x128xf32>
    %20 = vector.broadcast %1 : vector<1x128xf32> to vector<16x128xf32>
    %21 = arith.addf %19, %20 : vector<16x128xf32>
    %22 = vector.extract_strided_slice %21 {offsets = [0, 0], sizes = [8, 128], strides = [1, 1]} : vector<16x128xf32> to vector<8x128xf32>
    %23 = vector.extract_strided_slice %21 {offsets = [8, 0], sizes = [8, 128], strides = [1, 1]} : vector<16x128xf32> to vector<8x128xf32>
    %24 = arith.subf %22, %23 : vector<8x128xf32>
    %25 = math.absf %24 : vector<8x128xf32>
    %26 = vector.broadcast %2 : vector<1x128xf32> to vector<8x128xf32>
    %27 = arith.mulf %25, %26 : vector<8x128xf32>
    %cst_18 = arith.constant dense<0.000000e+00> : vector<8xf32>
    %28 = vector.multi_reduction <add>, %27, %cst_18 [1] : vector<8x128xf32> to vector<8xf32>
    %29 = vector.shape_cast %28 : vector<8xf32> to vector<8x1xf32>
    %30 = vector.broadcast %3 : vector<1x1xf32> to vector<8x1xf32>
    %31 = arith.addf %29, %30 : vector<8x1xf32>
    %32 = vector.shape_cast %31 : vector<8x1xf32> to vector<8x1xf32>
    %33 = vector.broadcast %32 : vector<8x1xf32> to vector<8x128xf32>
    %c0_19 = arith.constant 0 : index
    %c0_20 = arith.constant 0 : index
    %c0_21 = arith.constant 0 : index
    %34 = vector.load %arg6[%c0_19, %c0_20, %c0_21] : memref<1x8x128xf32, #tpu.memory_space<vmem>>, vector<1x8x128xf32>
    %35 = vector.shape_cast %34 : vector<1x8x128xf32> to vector<8x128xf32>
    %36 = vector.shape_cast %33 : vector<8x128xf32> to vector<1x8x128xf32>
    tpu.vector_store %arg6[%c0_19, %c0_20, %c0_21], %36 {strides = array<i32>} : memref<1x8x128xf32, #tpu.memory_space<vmem>>, vector<1x8x128xf32>,
    return
  }
  func.func @transform_0(%arg0: i32) -> (i32, i32, i32) {
    %c0_i32 = arith.constant 0 : i32
    %c0_i32_0 = arith.constant 0 : i32
    %c0_i32_1 = arith.constant 0 : i32
    return %arg0, %c0_i32, %c0_i32_0 : i32, i32, i32
  }
  func.func @transform_1(%arg0: i32) -> (i32, i32, i32) {
    %c0_i32 = arith.constant 0 : i32
    %c0_i32_0 = arith.constant 0 : i32
    %c0_i32_1 = arith.constant 0 : i32
    return %arg0, %c0_i32, %c0_i32_0 : i32, i32, i32
  }
  func.func @transform_2(%arg0: i32) -> (i32, i32, i32) {
    %c0_i32 = arith.constant 0 : i32
    %c0_i32_0 = arith.constant 0 : i32
    %c0_i32_1 = arith.constant 0 : i32
    return %arg0, %c0_i32, %c0_i32_0 : i32, i32, i32
  }
  func.func @transform_3(%arg0: i32) -> (i32, i32) {
    %c0_i32 = arith.constant 0 : i32
    %c0_i32_0 = arith.constant 0 : i32
    %c0_i32_1 = arith.constant 0 : i32
    return %c0_i32, %c0_i32_0 : i32, i32
  }
  func.func @transform_4(%arg0: i32) -> (i32, i32) {
    %c0_i32 = arith.constant 0 : i32
    %c0_i32_0 = arith.constant 0 : i32
    %c0_i32_1 = arith.constant 0 : i32
    return %c0_i32, %c0_i32_0 : i32, i32
  }
  func.func @transform_5(%arg0: i32) -> (i32, i32, i32) {
    %c0_i32 = arith.constant 0 : i32
    %c0_i32_0 = arith.constant 0 : i32
    %c0_i32_1 = arith.constant 0 : i32
    return %arg0, %c0_i32, %c0_i32_0 : i32, i32, i32
  }
}

</mosaic_0001>

<bundles_post_ra>
// kernel: tpu_custom_call.1
= control target key start
LH: loop header
LB: loop body
LE: loop exit
PB: predicated region body
PF: predicated region fallthrough
CT: control target
= control target key end

     0   :  { %s1839_s0 = inlined_call_operand.hbm [shape: bf16[2,128,128], index: 0, kind: input, shape index: {}]   ;;  %s1840_s1 = inlined_call_operand.hbm [shape: bf16[2,128,128], index: 1, kind: input, shape index: {}]   ;;  %s1841_s2 = inlined_call_operand.hbm [shape: bf16[2,16,128], index: 2, kind: input, shape index: {}]   ;;  %s1842_s3 = inlined_call_operand.hbm [shape: bf16[128,128], index: 3, kind: input, shape index: {}]   ;;  %s1843_s4 = inlined_call_operand.hbm [shape: f32[8,128], index: 4, kind: input, shape index: {}]   ;;  %s1844_s5 = inlined_call_operand.hbm [shape: f32[2,8,128], index: 5, kind: output, shape index: {}]  }
   0x1   :  { %1857 = sst [smem:[#allocation17_spill]] %s1840_s1 }
   0x2   :  { %1858 = sst [smem:[#allocation18_spill]] %s1842_s3 }
   0x3   :  { %1859 = sst [smem:[#allocation19_spill]] %s1843_s4 }
   0x4   :  { %10 = vsyncpa [#allocation3], 0 }
   0x5   :  { %12 = vsyncpa [#allocation3 + $0x1], 0 }
   0x6   :  { %13 = vsyncpa [#allocation6], 0 }
   0x7   :  { %15 = vsyncpa [#allocation6 + $0x1], 0 }
   0x8   :  { %16 = vsyncpa [#allocation9], 0 }
   0x9   :  { %17 = vsyncpa [#allocation4], 0 }
   0xa   :  { %19 = vsyncpa [#allocation4 + $0x1], 0  ;;  %s1534_s18 = smov 0   ;;  %s1536_s19 = smov 0  }
   0xb   :  { %s1538_s20 = smov 0   ;;  %s1540_s21 = smov 0  }
   0xc LB: > { %s1555_s22 = sadd.s32 4294967295, %s1491_s21   ;;  %s993_s23 = sadd.s32 4294967294, %s1491_s21   ;;  %s1491_s21 = sphi %s1540_s21, %s1890_s21   ;;  %s1487_s20 = sphi %s1538_s20, %s1889_s20   ;;  %s1483_s19 = sphi %s1536_s19, %s1888_s19   ;;  %s1479_s18 = sphi %s1534_s18, %s1887_s18  }
   0xd   : > { %s1559_s24 = sadd.s32 1, %s1491_s21   ;;  %s32_s25 = sadd.s32 1, %s1487_s20 }
   0xe   : > { %s29_s26 = ssub.s32 %s1491_s21, %s1559_s24  ;;  %p39_p0 = scmp.ne.s32.totalorder %s1487_s20, %s1483_s19 }
   0xf   : > { %p30_p1 = scmp.eq.s32.totalorder %s29_s26, 0  ;;  %p40_p2 = scmp.eq.s32.totalorder %s1491_s21, 0 }
  0x10   : > { %p45_p3 = scmp.ne.s32.totalorder %s1483_s19, %s1479_s18  ;;  %p1845_p4 = scmp.eq.s32.totalorder %s1555_s22, 0 }
  0x11   : > { %s1571_s27 = scalar_select %p30_p1, %s1487_s20, %s32_s25  }
  0x12   : > { %p1573_p5 = por %p40_p2, %p39_p0  ;;  %p1579_p6 = por %p1845_p4, %p45_p3 }
  0x13   : > { %1860 = sst [smem:[#allocation16_spill]] %s1571_s27  ;;  %p163_p7 = scmp.eq.s32.totalorder %s1555_s22, 1 }
  0x14   : > { %s1862_s29 = scalar_select %p1579_p6, 1, 0 }
  0x15   : > { %p169_p8 = scmp.eq.s32.totalorder %s993_s23, 1  ;;  %p994_p9 = scmp.ge.s32.totalorder %s1491_s21, 1 }
  0x16   : > { %p176_p10 = scmp.lt.s32.totalorder %s1491_s21, 3  ;;  %p1586_p11 = por %p163_p7, %p39_p0 }
  0x17   : > { %p1590_p12 = por %p169_p8, %p45_p3  ;;  %s1493_s8 = smov [#allocation8]  }
  0x18   : > { %s1863_s30 = scalar_select %p1586_p11, 1, 0 }
  0x19   : > { %s1864_s6 = scalar_select %p1590_p12, 1, 0 }
  0x1a   : > { %p1594_p13 = pnand %p994_p9, %p176_p10  ;;  %s188_s9 = sshll.u32 %s1493_s8, 4  ;;  %s189_s9 = int_to_ptr.vmem [resolvable:$true] %s188_s9 }
  0x1b   : > { %p1214_p3 = scmp.lt.s32.totalorder %s1491_s21, 2  ;;  %s1609_s11 = sand.u32 1, %s1487_s20  }
  0x1c   : > { %s1865_s7 = scalar_select %p1594_p13, 1, 0 }
  0x1d   : > { %p1191_p1 = pneg %p1594_p13  ;;  %s1294_s13 = scalar_lea.vmem %s189_s9, 1024 }
  0x1e   : > { %p1295_p8 = scmp.ne.s32.totalorder %s189_s9, %s1294_s13 }
  0x1f   : > { %p1602_p2 = pnand %p1191_p1, %p1845_p4  ;;  %p1302_p1 = scmp.lt.s32.totalorder %s189_s9, %s189_s9 }
  0x20   : > { %p1303_p4 = scmp.lt.s32.totalorder %s1294_s13, %s1294_s13 }
  0x21   : > { %s1866_s10 = scalar_select %p1602_p2, 1, 0 }
  0x22   : > { %p1852_p7 = pneg %p1602_p2  ;;  %p1304_p12 = por %p1303_p4, %p1302_p1 }
  0x24   : > { %p1297_p9 = pnand %p1295_p8, %p1852_p7 }
  0x26   : > { %p1298_p10 = pneg %p1297_p9 }
  0x28   : > { %p1305_p11 = pnand %p1304_p12, %p1298_p10 }
  0x2a   : > { %1308 = shalt.err (!%p1305_p11)
}
  0x2b   : > { %s1847_s14 = smov 64   ;;  %s1850_s15 = smov 4  }
  0x2c   : > { %s1867_s3 = sld [smem:[#allocation18_spill]]  ;;  %s1849_s23 = sshll.u32 %s1491_s21, 10 }
  0x2d   : > { %p1630_p4 = pnand %p1214_p3, %p1573_p5  ;;  %s234_s26 = sand.u32 1, %s1491_s21  }
  0x2e   : > { %s1869_s1 = sld [smem:[#allocation17_spill]]  ;;  %s1870_s27 = sshll.u32 %s1609_s11, 6 }
  0x2f   : > { %s1646_s28 = scalar_lea.sflag [#allocation6], %s234_s26  ;;  %p1652_p11 = pneg %p1630_p4 }
  0x32   : > { %1194 = dma.hbm_to_vmem [thread:$0]  (!%p1602_p2), %s1867_s3, 1024, %s189_s9, [#allocation9], %s1847_s14, %s1847_s14, %s1850_s15  }
  0x33   : > { %s238_s9 = scalar_lea.vmem [#allocation5], %s1870_s27 }
  0x34   : > { %s1640_s12 = scalar_lea.hbm %s1869_s1, %s1849_s23  ;;  %s245_s16 = sshll.u32 %s238_s9, 4  ;;  %s1644_s16 = int_to_ptr.vmem [resolvable:$true] %s245_s16 }
  0x35   : > { %s1309_s17 = scalar_lea.hbm %s1640_s12, 1024  ;;  %s1314_s27 = scalar_lea.hbm %s1869_s1, 2048 }
  0x36   : > { %p1310_p5 = scmp.ne.s32.totalorder %s1640_s12, %s1309_s17  ;;  %p1315_p8 = scmp.lt.s32.totalorder %s1640_s12, %s1869_s1 }
  0x37   : > { %p1316_p9 = scmp.lt.s32.totalorder %s1314_s27, %s1309_s17 }
  0x38   : > { %p1312_p12 = pnand %p1652_p11, %p1310_p5 }
  0x39   : > { %p1317_p10 = por %p1316_p9, %p1315_p8 }
  0x3a   : > { %p1313_p3 = pneg %p1312_p12 }
  0x3c   : > { %p1318_p1 = pnand %p1317_p10, %p1313_p3 }
  0x3e   : > { %1321 = shalt.err (!%p1318_p1)
}
  0x3f   : > { %s1322_s26 = scalar_lea.vmem %s1644_s16, 1024  ;;  %s1496_s15 = smov [#allocation5]  }
  0x40   : > { %p1323_p0 = scmp.ne.s32.totalorder %s1644_s16, %s1322_s26  ;;  %s1327_s8 = sshll.u32 %s1496_s15, 4  ;;  %s1328_s8 = int_to_ptr.vmem [resolvable:$false] %s1327_s8 }
  0x41   : > { %s1329_s13 = scalar_lea.vmem %s1328_s8, 2048  ;;  %p1330_p7 = scmp.lt.s32.totalorder %s1644_s16, %s1328_s8 }
  0x42   : > { %p1325_p5 = pnand %p1323_p0, %p1652_p11  ;;  %p1331_p6 = scmp.lt.s32.totalorder %s1329_s13, %s1322_s26 }
  0x44   : > { %p1326_p12 = pneg %p1325_p5  ;;  %p1332_p13 = por %p1331_p6, %p1330_p7 }
  0x46   : > { %p1333_p2 = pnand %p1332_p13, %p1326_p12 }
  0x48   : > { %1336 = shalt.err (!%p1333_p2)
}
  0x49   : > { %s1872_s23 = smov 4   ;;  %s1873_s17 = smov 64  }
  0x4a   : > { %1204 = dma.hbm_to_vmem [thread:$0]  (!%p1630_p4), %s1640_s12, 1024, %s1644_s16, %s1646_s28, %s1873_s17, %s1873_s17, %s1872_s23  }
  0x4b   : > { %s1497_s27 = smov [#allocation10]   ;;  %p1874_p3 = scmp.ne.s32.totalorder %s1866_s10, 0 }
  0x4c   : > { %s202_s9 = sshll.u32 %s1497_s27, 4  ;;  %s203_s9 = int_to_ptr.vmem [resolvable:$true] %s202_s9 }
  0x4d   : > { %s1348_s15 = scalar_lea.vmem %s203_s9, 128  ;;  %p1875_p8 = pneg %p1874_p3 }
  0x4e   : > { %p1349_p0 = scmp.ne.s32.totalorder %s203_s9, %s1348_s15  ;;  %p1356_p2 = scmp.lt.s32.totalorder %s203_s9, %s203_s9 }
  0x4f   : > { %p1357_p7 = scmp.lt.s32.totalorder %s1348_s15, %s1348_s15 }
  0x50   : > { %p1351_p6 = pnand %p1349_p0, %p1875_p8 }
  0x51   : > { %p1358_p9 = por %p1357_p7, %p1356_p2 }
  0x52   : > { %p1352_p13 = pneg %p1351_p6 }
  0x54   : > { %p1359_p10 = pnand %p1358_p9, %p1352_p13 }
  0x56   : > { %1362 = shalt.err (!%p1359_p10)
}
  0x57   : > { %s1876_s4 = sld [smem:[#allocation19_spill]]  ;;  %s1877_s12 = sshll.u32 %s1491_s21, 10 }
  0x58   : > { %s1691_s27 = scalar_lea.hbm %s1839_s0, %s1877_s12  ;;  %s1878_s15 = sshll.u32 %s1609_s11, 6 }
  0x59   : > { %s217_s10 = scalar_lea.vmem [#allocation2], %s1878_s15  ;;  %s1004_s26 = sshll.u32 %s1609_s11, 3 }
  0x5a   : > { %s224_s1 = sshll.u32 %s217_s10, 4  ;;  %s214_s8 = scalar_lea.sflag [#allocation3], %s1609_s11  ;;  %s1695_s1 = int_to_ptr.vmem [resolvable:$true] %s224_s1 }
  0x5b   : > { %s1363_s3 = scalar_lea.hbm %s1691_s27, 1024  ;;  %s1368_s12 = scalar_lea.hbm %s1839_s0, 2048 }
  0x5c   : > { %p1364_p1 = scmp.ne.s32.totalorder %s1691_s27, %s1363_s3  ;;  %p1369_p0 = scmp.lt.s32.totalorder %s1691_s27, %s1839_s0 }
  0x5d   : > { %1197 = dma.hbm_to_vmem [thread:$0]  (!%p1874_p3), %s1876_s4, 128, %s203_s9, [#allocation9]  }
  0x5e   : > { %p1366_p5 = pnand %p1364_p1, %p1652_p11  ;;  %p1370_p3 = scmp.lt.s32.totalorder %s1368_s12, %s1363_s3 }
  0x60   : > { %p1367_p12 = pneg %p1366_p5  ;;  %p1371_p8 = por %p1370_p3, %p1369_p0 }
  0x62   : > { %p1372_p6 = pnand %p1371_p8, %p1367_p12 }
  0x64   : > { %1375 = shalt.err (!%p1372_p6)
}
  0x65   : > { %s1376_s15 = scalar_lea.vmem %s1695_s1, 1024  ;;  %s1498_s10 = smov [#allocation2]  }
  0x66   : > { %p1377_p13 = scmp.ne.s32.totalorder %s1695_s1, %s1376_s15  ;;  %s1381_s4 = sshll.u32 %s1498_s10, 4  ;;  %s1382_s4 = int_to_ptr.vmem [resolvable:$false] %s1381_s4 }
  0x67   : > { %s1383_s9 = scalar_lea.vmem %s1382_s4, 2048  ;;  %p1384_p9 = scmp.lt.s32.totalorder %s1695_s1, %s1382_s4 }
  0x68   : > { %p1379_p2 = pnand %p1377_p13, %p1652_p11  ;;  %p1385_p10 = scmp.lt.s32.totalorder %s1383_s9, %s1376_s15 }
  0x6a   : > { %p1380_p7 = pneg %p1379_p2  ;;  %p1386_p1 = por %p1385_p10, %p1384_p9 }
  0x6c   : > { %p1387_p5 = pnand %p1386_p1, %p1380_p7 }
  0x6e   : > { %1390 = shalt.err (!%p1387_p5)
}
  0x6f   : > { %1201 = dma.hbm_to_vmem [thread:$0]  (!%p1630_p4), %s1691_s27, 1024, %s1695_s1, %s214_s8, %s1873_s17, %s1873_s17, %s1872_s23  }
  0x70   : > { %s1049_s3 = sshll.u32 %s1491_s21, 7  ;;  %s259_s15 = scalar_lea.vmem [#allocation7], %s1004_s26 }
  0x71   : > { %s1726_s13 = scalar_lea.hbm %s1841_s2, %s1049_s3  ;;  %s266_s10 = sshll.u32 %s259_s15, 4  ;;  %s267_s10 = int_to_ptr.vmem [resolvable:$true] %s266_s10 }
  0x72   : > { %s1391_s4 = scalar_lea.hbm %s1726_s13, 128  ;;  %s1396_s27 = scalar_lea.hbm %s1841_s2, 256 }
  0x73   : > { %p1392_p12 = scmp.ne.s32.totalorder %s1726_s13, %s1391_s4  ;;  %p1397_p8 = scmp.lt.s32.totalorder %s1726_s13, %s1841_s2 }
  0x74   : > { %p1398_p6 = scmp.lt.s32.totalorder %s1396_s27, %s1391_s4 }
  0x75   : > { %p1394_p0 = pnand %p1392_p12, %p1652_p11 }
  0x76   : > { %p1399_p13 = por %p1398_p6, %p1397_p8 }
  0x77   : > { %p1395_p3 = pneg %p1394_p0 }
  0x79   : > { %p1400_p2 = pnand %p1399_p13, %p1395_p3 }
  0x7b   : > { %1403 = shalt.err (!%p1400_p2)
}
  0x7c   : > { %s1404_s11 = scalar_lea.vmem %s267_s10, 128  ;;  %s1499_s26 = smov [#allocation7]  }
  0x7d   : > { %p1405_p7 = scmp.ne.s32.totalorder %s267_s10, %s1404_s11  ;;  %s1409_s3 = sshll.u32 %s1499_s26, 4  ;;  %s1410_s3 = int_to_ptr.vmem [resolvable:$false] %s1409_s3 }
  0x7e   : > { %s1411_s16 = scalar_lea.vmem %s1410_s3, 256  ;;  %p1412_p1 = scmp.lt.s32.totalorder %s267_s10, %s1410_s3 }
  0x7f   : > { %p1407_p9 = pnand %p1405_p7, %p1652_p11  ;;  %p1413_p5 = scmp.lt.s32.totalorder %s1411_s16, %s1404_s11 }
  0x81   : > { %p1408_p10 = pneg %p1407_p9  ;;  %p1414_p12 = por %p1413_p5, %p1412_p1 }
  0x83   : > { %p1415_p0 = pnand %p1414_p12, %p1408_p10 }
  0x85   : > { %1418 = shalt.err (!%p1415_p0)
}
  0x86   : > { %1207 = dma.hbm_to_vmem [thread:$0]  (!%p1630_p4), %s1726_s13, 128, %s267_s10, %s1646_s28, %s1873_s17, %s1873_s17, %s1872_s23  }
  0x87   : > { %p1879_p11 = scmp.ne.s32.totalorder %s1865_s7, 0 }
  0x88   : > { %s1753_s14 = sand.u32 (!%p1879_p11), 1, %s1483_s19   ;;  %p1880_p3 = scmp.ne.s32.totalorder (!%p1879_p11), %s1862_s29, 0 }
  0x89   : > { %278 = sbr.rel (%p1879_p11) target bundleno = 1124 (0x464), region = 40  ;;  %s1008_s15 = sshll.u32 (!%p1879_p11), %s1753_s14, 6 }
  0x8a   : > { %s281_s4 = scalar_lea.sflag (!%p1879_p11), [#allocation3], %s1753_s14  ;;  %s1757_s9 = scalar_lea.vmem (!%p1879_p11), [#allocation2], %s1008_s15 }
  0x8e   : > { %1462 = dma.done.wait (%p1880_p3), %s281_s4, 1024  }
  0x8f   : > { %1464 = vsyncadd (%p1880_p3), %s281_s4, 4294966272  ;;  %s289_s25 = sand.u32 1, %s1555_s22   ;;  %s1764_s28 = scalar_lea.vmem [#allocation5], %s1008_s15 }
  0x90   : > { %s290_s7 = scalar_lea.sflag [#allocation6], %s289_s25 }
  0x91   : > { %1466 = dma.done.wait (%p1880_p3), %s290_s7, 1152  }
  0x92   : > { %1468 = vsyncadd (%p1880_p3), %s290_s7, 4294966144  ;;  %s1010_s23 = sshll.u32 %s1753_s14, 3  ;;  %p1881_p4 = scmp.eq.s32.totalorder %s1555_s22, 0 }
  0x93   : > { %s1773_s17 = scalar_lea.vmem [#allocation7], %s1010_s23 }
  0x94   : > { %1470 = dma.done.wait (%p1881_p4), [#allocation9], 1152   ;;  %p1882_p8 = pmov %p1881_p4 }
  0x95   : > { %v1258_v0 = vld [vmem:[%s1764_s28 + $0x38] sm:$0xff]   ;;  %v1259_v1 = vld [vmem:[%s1764_s28 + $0x30] sm:$0xff]   ;;  %v1260_v2 = vld [vmem:[%s1764_s28 + $0x28] sm:$0xff]   ;;  %vm1501_vm0 = vmmov 0   ;;  %s346_s29 = scalar_lea.vmem [#allocation11], %s1010_s23  ;;  %s1044_s10 = sshll.u32 %s1555_s22, 7 }
  0x96   : > { %1472 = vsyncadd (%p1882_p8), [#allocation9], 4294966144  ;;  %1091 = vmatprep.subr.bf16.mxu0 %v1258_v0  ;;  %v1261_v3 = vld [vmem:[%s1764_s28 + $0x20] sm:$0xff]   ;;  %v1262_v5 = vld [vmem:[%s1764_s28 + $0x18] sm:$0xff]   ;;  %s861_s13 = sshll.u32 %s346_s29, 4  ;;  %s859_s8 = scalar_lea.hbm %s1844_s5, %s1044_s10  ;;  %s1799_s13 = int_to_ptr.vmem [resolvable:$true] %s861_s13 }
  0x97   : > { %1092 = vmatpush3.bf16.msra.mxu0 %v1258_v0  ;;  %v1266_v4 = vld [vmem:[%s1757_s9] sm:$0xff]   ;;  %v1263_v6 = vld [vmem:[%s1764_s28 + $0x10] sm:$0xff]   ;;  %v1274_v7 = vld [vmem:[#allocation8 + $0x38] sm:$0xff]   ;;  %s848_s12 = scalar_lea.sflag [#allocation4], %s1753_s14  ;;  %s1419_s11 = scalar_lea.vmem %s1799_s13, 128 }
  0x98   : > { %1093 = vmatprep.subr.bf16.mxu0 %v1259_v1  ;;  %1107 = vmatprep.mubr.bf16.mxu0 %v1266_v4  ;;  %v1275_v8 = vld [vmem:[#allocation8 + $0x30] sm:$0xff]   ;;  %v1264_v9 = vld [vmem:[%s1764_s28 + $0x8] sm:$0xff]   ;;  %v1276_v10 = vld [vmem:[#allocation8 + $0x28] sm:$0xff]   ;;  %p1420_p6 = scmp.ne.s32.totalorder %s1799_s13, %s1419_s11  ;;  %p1883_p13 = scmp.ne.s32.totalorder %s1863_s30, 0 }
  0x99   : > { %1123 = vmatprep.subr.bf16.mxu1 %v1274_v7  ;;  %v1265_v11 = vld [vmem:[%s1764_s28] sm:$0xff]   ;;  %v1277_v12 = vld [vmem:[#allocation8 + $0x20] sm:$0xff]   ;;  %v1278_v13 = vld [vmem:[#allocation8 + $0x18] sm:$0xff]   ;;  %s1503_s26 = smov [#allocation11]  }
  0x9a   : > { %1124 = vmatpush3.bf16.msra.mxu1 %v1274_v7  ;;  %v1267_v14 = vld [vmem:[%s1757_s9 + $0x8] sm:$0xff]   ;;  %v1268_v15 = vld [vmem:[%s1757_s9 + $0x10] sm:$0xff]   ;;  %v1269_v16 = vld [vmem:[%s1757_s9 + $0x18] sm:$0xff]   ;;  %p1421_p2 = pnand %p1420_p6, %p1883_p13  ;;  %s1423_s3 = sshll.u32 %s1503_s26, 4  ;;  %s1424_s3 = int_to_ptr.vmem [resolvable:$false] %s1423_s3 }
  0x9b   : > { %1094 = vmatpush3.bf16.msra.mxu0 %v1259_v1  ;;  %1125 = vmatprep.subr.bf16.mxu1 %v1275_v8  ;;  %v1270_v17 = vld [vmem:[%s1757_s9 + $0x20] sm:$0xff]   ;;  %v1271_v18 = vld [vmem:[%s1757_s9 + $0x28] sm:$0xff]   ;;  %v1272_v19 = vld [vmem:[%s1757_s9 + $0x30] sm:$0xff]   ;;  %s1425_s22 = scalar_lea.vmem %s1424_s3, 256  ;;  %p1426_p9 = scmp.lt.s32.totalorder %s1799_s13, %s1424_s3 }
  0x9c   : > { %1095 = vmatprep.subr.bf16.mxu0 %v1260_v2  ;;  %v1273_v20 = vld [vmem:[%s1757_s9 + $0x38] sm:$0xff]   ;;  %v1279_v21 = vld [vmem:[#allocation8 + $0x10] sm:$0xff]   ;;  %v1281_v23 = vld [vmem:[#allocation8] sm:$0xff]   ;;  %p1422_p7 = pneg %p1421_p2  ;;  %p1427_p10 = scmp.lt.s32.totalorder %s1425_s22, %s1419_s11 }
  0x9d   : > { %v1280_v22 = vld [vmem:[#allocation8 + $0x8] sm:$0xff]   ;;  %v1014_v26 = vld [vmem:[#allocation10] ss:$0 sm:$0xff] }
  0x9e   : > { %1126 = vmatpush3.bf16.msra.mxu1 %v1275_v8  ;;  %p1428_p1 = por %p1427_p10, %p1426_p9 }
  0x9f   : > { %1096 = vmatpush3.bf16.msra.mxu0 %v1260_v2  ;;  %1127 = vmatprep.subr.bf16.mxu1 %v1276_v10 }
  0xa0   : > { %1097 = vmatprep.subr.bf16.mxu0 %v1261_v3  ;;  %p1429_p5 = pnand %p1428_p1, %p1422_p7 }
  0xa2   : > { %1128 = vmatpush3.bf16.msra.mxu1 %v1276_v10 }
  0xa3   : > { %1098 = vmatpush3.bf16.msra.mxu0 %v1261_v3  ;;  %1129 = vmatprep.subr.bf16.mxu1 %v1277_v12 }
  0xa4   : > { %1099 = vmatprep.subr.bf16.mxu0 %v1262_v5 }
  0xa6   : > { %1130 = vmatpush3.bf16.msra.mxu1 %v1277_v12 }
  0xa7   : > { %1100 = vmatpush3.bf16.msra.mxu0 %v1262_v5  ;;  %1131 = vmatprep.subr.bf16.mxu1 %v1278_v13 }
  0xa8   : > { %1101 = vmatprep.subr.bf16.mxu0 %v1263_v6 }
  0xaa   : > { %1132 = vmatpush3.bf16.msra.mxu1 %v1278_v13 }
  0xab   : > { %1102 = vmatpush3.bf16.msra.mxu0 %v1263_v6  ;;  %1133 = vmatprep.subr.bf16.mxu1 %v1279_v21 }
  0xac   : > { %1103 = vmatprep.subr.bf16.mxu0 %v1264_v9 }
  0xae   : > { %1134 = vmatpush3.bf16.msra.mxu1 %v1279_v21 }
  0xaf   : > { %1104 = vmatpush3.bf16.msra.mxu0 %v1264_v9  ;;  %1135 = vmatprep.subr.bf16.mxu1 %v1280_v22 }
  0xb0   : > { %1105 = vmatprep.subr.bf16.mxu0 %v1265_v11 }
  0xb2   : > { %1136 = vmatpush3.bf16.msra.mxu1 %v1280_v22 }
  0xb3   : > { %1106 = vmatpush3.bf16.msra.mxu0 %v1265_v11  ;;  %1137 = vmatprep.subr.bf16.mxu1 %v1281_v23 }
  0xb6   : > { %1108 = vmatmul.mubr.bf16.vlgmr.msra.gmra.mxu0 %v1267_v14  ;;  %1138 = vmatpush3.bf16.msra.mxu1 %v1281_v23 }
  0xb7   : > { %1111 = vmatprep.mubr.bf16.mxu0 %v1268_v15 }
  0xbe   : > { %1112 = vmatmul.mubr.bf16.gmra.mxu0 %v1269_v16 }
  0xbf   : > { %1115 = vmatprep.mubr.bf16.mxu0 %v1270_v17  ;;  %v1500_v17 = vmov 0.0  }
  0xc0   : > { %1155 = vmatprep.subr.bf16.mxu0 %v1500_v17 }
  0xc6   : > { %1116 = vmatmul.mubr.bf16.gmra.mxu0 %v1271_v18 }
  0xc7   : > { %1119 = vmatprep.mubr.bf16.mxu0 %v1272_v19 }
  0xce   : > { %1120 = vmatmul.mubr.bf16.gmra.mxu0 %v1273_v20 }
  0xcf   : > { %1171 = vmatprep.mubr.msk.bf16.mxu0 %vm1501_vm0, %v1500_v17 }
 0x176   : > { %v1109_v24 = vpop.f32.mrf.mxu0 }
 0x177   : > { %v527_v30 = vadd.f32 %v1109_v24, %v1014_v26 }
 0x178   : > { %v518_v25 = vpop.f32.mrf.mxu0 }
 0x179   : > { %v519_v28 = vadd.f32 %v1014_v26, %v518_v25  ;;  %v583_v37 = vmax.f32 %v527_v30, 0.0 }
 0x17a   : > { %v1110_v27 = vpop.f32.mrf.mxu0 }
 0x17b   : > { %v530_v29 = vadd.f32 %v1110_v27, %v1014_v26  ;;  %v581_v35 = vmax.f32 %v519_v28, 0.0 }
 0x17c   : > { %v521_v31 = vpop.f32.mrf.mxu0 }
 0x17d   : > { %v522_v32 = vadd.f32 %v1014_v26, %v521_v31  ;;  %v584_v33 = vmax.f32 %v530_v29, 0.0 }
 0x17e   : > { %v1113_v34 = vpop.f32.mrf.mxu0 }
 0x17f   : > { %v582_v36 = vmax.f32 %v522_v32, 0.0  ;;  %v598_v40 = vpack.c.bf16 %v584_v33, %v583_v37  ;;  %v543_v44 = vadd.f32 %v1113_v34, %v1014_v26 }
 0x180   : > { %v534_v38 = vpop.f32.mrf.mxu0 }
 0x181   : > { %v597_v39 = vpack.c.bf16 %v582_v36, %v581_v35  ;;  %v535_v42 = vadd.f32 %v1014_v26, %v534_v38  ;;  %v587_v51 = vmax.f32 %v543_v44, 0.0  ;;  %v1039_v44 = vld [vmem:[#allocation10 + $0x1] ss:$0 sm:$0xff] }
 0x182   : > { %v1114_v41 = vpop.f32.mrf.mxu0 }
 0x183   : > { %v546_v43 = vadd.f32 %v1114_v41, %v1014_v26  ;;  %1139 = vmatprep.mubr.bf16.mxu1 %v597_v39  ;;  %v585_v49 = vmax.f32 %v535_v42, 0.0  ;;  %v1282_v42 = vld [vmem:[%s1773_s17] sm:$0xff]  }
 0x184   : > { %v537_v45 = vpop.f32.mrf.mxu0  ;;  %1140 = vmatmul.mubr.bf16.vlgmr.msra.gmra.mxu1 %v598_v40 }
 0x185   : > { %v538_v46 = vadd.f32 %v1014_v26, %v537_v45  ;;  %v588_v47 = vmax.f32 %v546_v43, 0.0 }
 0x186   : > { %v1117_v48 = vpop.f32.mrf.mxu0 }
 0x187   : > { %v586_v50 = vmax.f32 %v538_v46, 0.0  ;;  %v600_v54 = vpack.c.bf16 %v588_v47, %v587_v51  ;;  %v559_v58 = vadd.f32 %v1117_v48, %v1014_v26  ;;  %v1041_v51 = vld [vmem:[#allocation10 + $0x2] ss:$0 sm:$0xff] }
 0x188   : > { %v550_v52 = vpop.f32.mrf.mxu0 }
 0x189   : > { %v599_v53 = vpack.c.bf16 %v586_v50, %v585_v49  ;;  %v551_v56 = vadd.f32 %v1014_v26, %v550_v52  ;;  %v591_v1 = vmax.f32 %v559_v58, 0.0 }
 0x18a   : > { %v1118_v55 = vpop.f32.mrf.mxu0 }
 0x18b   : > { %v562_v57 = vadd.f32 %v1118_v55, %v1014_v26  ;;  %1143 = vmatprep.mubr.bf16.mxu1 %v599_v53  ;;  %v589_v63 = vmax.f32 %v551_v56, 0.0  ;;  %v1042_v55 = vld [vmem:[#allocation10 + $0x3] ss:$0 sm:$0xff] }
 0x18c   : > { %v553_v59 = vpop.f32.mrf.mxu0  ;;  %1144 = vmatmul.mubr.bf16.gmra.mxu1 %v600_v54  ;;  %v1502_v54 = vmov 0  }
 0x18d   : > { %v554_v60 = vadd.f32 %v1014_v26, %v553_v59  ;;  %v592_v61 = vmax.f32 %v562_v57, 0.0  ;;  %1257 = vset.pattern.permute.xlu0 %v1502_v54 }
 0x18e   : > { %v1121_v62 = vpop.f32.mrf.mxu0 }
 0x18f   : > { %v590_v0 = vmax.f32 %v554_v60, 0.0  ;;  %v602_v4 = vpack.c.bf16 %v592_v61, %v591_v1  ;;  %v575_v8 = vadd.f32 %v1121_v62, %v1014_v26 }
 0x190   : > { %v566_v2 = vpop.f32.mrf.mxu0 }
 0x191   : > { %v601_v3 = vpack.c.bf16 %v590_v0, %v589_v63  ;;  %v567_v6 = vadd.f32 %v1014_v26, %v566_v2  ;;  %v595_v14 = vmax.f32 %v575_v8, 0.0 }
 0x192   : > { %v1122_v5 = vpop.f32.mrf.mxu0 }
 0x193   : > { %v578_v7 = vadd.f32 %v1122_v5, %v1014_v26  ;;  %1147 = vmatprep.mubr.bf16.mxu1 %v601_v3  ;;  %v593_v12 = vmax.f32 %v567_v6, 0.0 }
 0x194   : > { %v569_v9 = vpop.f32.mrf.mxu0  ;;  %1148 = vmatmul.mubr.bf16.gmra.mxu1 %v602_v4 }
 0x195   : > { %v570_v10 = vadd.f32 %v1014_v26, %v569_v9  ;;  %v596_v11 = vmax.f32 %v578_v7, 0.0 }
 0x197   : > { %v594_v13 = vmax.f32 %v570_v10, 0.0  ;;  %v604_v16 = vpack.c.bf16 %v596_v11, %v595_v14 }
 0x199   : > { %v603_v15 = vpack.c.bf16 %v594_v13, %v593_v12 }
 0x19b   : > { %1151 = vmatprep.mubr.bf16.mxu1 %v603_v15 }
 0x19c   : > { %1152 = vmatmul.mubr.bf16.gmra.mxu1 %v604_v16 }
 0x244   : > { %v1141_v18 = vpop.f32.mrf.mxu1 }
 0x246   : > { %v703_v19 = vpop.f32.mrf.mxu1 }
 0x248   : > { %v1142_v20 = vpop.f32.mrf.mxu1 }
 0x249   : > { %v769_v40 = vpack.c.bf16 %v1142_v20, %v1141_v18 }
 0x24a   : > { %v706_v21 = vpop.f32.mrf.mxu1 }
 0x24b   : > { %v768_v41 = vpack.c.bf16 %v706_v21, %v703_v19 }
 0x24c   : > { %v1145_v22 = vpop.f32.mrf.mxu1 }
 0x24e   : > { %v719_v23 = vpop.f32.mrf.mxu1 }
 0x250   : > { %v1146_v24 = vpop.f32.mrf.mxu1 }
 0x251   : > { %v771_v38 = vpack.c.bf16 %v1146_v24, %v1145_v22 }
 0x252   : > { %v722_v25 = vpop.f32.mrf.mxu1 }
 0x253   : > { %v770_v39 = vpack.c.bf16 %v722_v25, %v719_v23 }
 0x254   : > { %v1149_v26 = vpop.f32.mrf.mxu1 }
 0x256   : > { %v735_v27 = vpop.f32.mrf.mxu1 }
 0x258   : > { %v1150_v28 = vpop.f32.mrf.mxu1 }
 0x259   : > { %v773_v36 = vpack.c.bf16 %v1150_v28, %v1149_v26 }
 0x25a   : > { %v738_v29 = vpop.f32.mrf.mxu1 }
 0x25b   : > { %v772_v37 = vpack.c.bf16 %v738_v29, %v735_v27 }
 0x25c   : > { %v1153_v30 = vpop.f32.mrf.mxu1 }
 0x25e   : > { %v751_v31 = vpop.f32.mrf.mxu1 }
 0x260   : > { %v1154_v32 = vpop.f32.mrf.mxu1 }
 0x261   : > { %v775_v33 = vpack.c.bf16 %v1154_v32, %v1153_v30 }
 0x262   : > { %v754_v34 = vpop.f32.mrf.mxu1 }
 0x263   : > { %1156 = vmatpush3.bf16.msra.mxu0 %v775_v33  ;;  %v774_v35 = vpack.c.bf16 %v754_v34, %v751_v31 }
 0x264   : > { %1157 = vmatprep.subr.bf16.mxu0 %v1500_v17 }
 0x267   : > { %1158 = vmatpush3.bf16.msra.mxu0 %v774_v35 }
 0x268   : > { %1159 = vmatprep.subr.bf16.mxu0 %v1500_v17 }
 0x26b   : > { %1160 = vmatpush3.bf16.msra.mxu0 %v773_v36 }
 0x26c   : > { %1161 = vmatprep.subr.bf16.mxu0 %v1500_v17 }
 0x26f   : > { %1162 = vmatpush3.bf16.msra.mxu0 %v772_v37 }
 0x270   : > { %1163 = vmatprep.subr.bf16.mxu0 %v1500_v17 }
 0x273   : > { %1164 = vmatpush3.bf16.msra.mxu0 %v771_v38 }
 0x274   : > { %1165 = vmatprep.subr.bf16.mxu0 %v1500_v17 }
 0x277   : > { %1166 = vmatpush3.bf16.msra.mxu0 %v770_v39 }
 0x278   : > { %1167 = vmatprep.subr.bf16.mxu0 %v1500_v17 }
 0x27b   : > { %1168 = vmatpush3.bf16.msra.mxu0 %v769_v40 }
 0x27c   : > { %1169 = vmatprep.subr.bf16.mxu0 %v1500_v17 }
 0x27f   : > { %1170 = vmatpush3.bf16.msra.mxu0 %v768_v41 }
 0x282   : > { %1172 = vmatmul.mubr.bf16.vlgmr.msra.gmra.mxu0 %v1282_v42 }
 0x342   : > { %v820_v43 = vpop.f32.mrf.mxu0 }
 0x343   : > { %v821_v47 = vadd.f32 %v1039_v44, %v820_v43 }
 0x344   : > { %v1173_v45 = vpop.f32.mrf.mxu0 }
 0x346   : > { %v823_v46 = vpop.f32.mrf.mxu0 }
 0x347   : > { %v824_v48 = vadd.f32 %v1039_v44, %v823_v46 }
 0x348   : > { %v1174_v49 = vpop.f32.mrf.mxu0 }
 0x349   : > { %v827_v50 = vsub.f32 %v821_v47, %v824_v48 }
 0x34b   : > { %v828_v52 = vand.u32 2147483647, %v827_v50 }
 0x34d   : > { %v833_v53 = vmul.f32 %v1041_v51, %v828_v52 }
 0x34f   : > { %834 = vadd.xlane.f32.xlu0 %v833_v53 }
 0x3d8   : > { %v835_v56 = vpop.xlane.xlu0 %834 }
 0x3d9   : > { %v840_v57 = vadd.f32 %v1042_v55, %v835_v56 }
 0x3db   : > { %843 = vperm.xlu0 %1257, %v840_v57  }
 0x456   : > { %v844_v58 = vpop.permute.xlu0 %843 }
 0x457   : > { %846 = vst [vmem:[%s346_s29] sm:$0xff] %v844_v58 }
 0x458   : > { %1432 = shalt.err (!%p1429_p5)
}
 0x459   : > { %s1433_s16 = scalar_lea.hbm %s859_s8, 128  ;;  %s1437_s4 = scalar_lea.hbm %s1844_s5, 256 }
 0x45a   : > { %p1434_p12 = scmp.ne.s32.totalorder %s859_s8, %s1433_s16  ;;  %p1438_p3 = scmp.lt.s32.totalorder %s859_s8, %s1844_s5 }
 0x45b   : > { %p1439_p4 = scmp.lt.s32.totalorder %s1437_s4, %s1433_s16 }
 0x45c   : > { %p1435_p0 = pnand %p1434_p12, %p1883_p13 }
 0x45d   : > { %p1440_p8 = por %p1439_p4, %p1438_p3 }
 0x45e   : > { %p1436_p11 = pneg %p1435_p0 }
 0x460   : > { %p1441_p6 = pnand %p1440_p8, %p1436_p11 }
 0x462   : > { %1444 = shalt.err (!%p1441_p6)
}
 0x463   : > { %1189 = dma.vmem_to_hbm [thread:$0]  (%p1883_p13), %s1799_s13, 128, %s859_s8, %s848_s12  }
 0x464 PF: > { %s873_s7 = sand.u32 1, %s1479_s18   ;;  %p1884_p2 = scmp.ne.s32.totalorder %s1864_s6, 0 }
 0x465   : > { %p1885_p7 = scmp.ge.s32.totalorder %s1491_s21, 2  ;;  %s874_s28 = scalar_lea.sflag [#allocation4], %s873_s7 }
 0x467   : > { %p1209_p9 = pnand %p1885_p7, %p1884_p2 }
 0x469   : > { %p1210_p10 = pneg %p1209_p9 }
 0x46b   : > { %1474 = dma.done.wait (%p1210_p10), %s874_s28, 128  }
 0x46c   : > { %1476 = vsyncadd (%p1210_p10), %s874_s28, 4294967168  ;;  %s1886_s23 = sld [smem:[#allocation16_spill]]  ;;  %p22_p1 = scmp.ge.s32.totalorder %s1559_s24, 4  }
 0x46d   : > { %s1887_s18 = smov %s1483_s19  ;;  %s1888_s19 = smov %s1487_s20 }
 0x46e   : > { %s1890_s21 = smov %s1559_s24  ;;  %24 = sbr.rel (!%p22_p1) target bundleno = 12 (0xc), region = 117 }
 0x472   : > { %s1889_s20 = smov %s1886_s23 }
 0x473   :  { %879 = vsyncpa [#allocation3], 1 }
 0x474   :  { %881 = vsyncpa [#allocation3 + $0x1], 1 }
 0x475   :  { %882 = vsyncpa [#allocation6], 1 }
 0x476   :  { %884 = vsyncpa [#allocation6 + $0x1], 1 }
 0x477   :  { %885 = vsyncpa [#allocation9], 1 }
 0x478   :  { %886 = vsyncpa [#allocation4], 1 }
 0x479   :  { %888 = vsyncpa [#allocation4 + $0x1], 1 }

</bundles_post_ra>
